<compile_context>
chip_gen: v7x
topology: tpu7x:2x2x1
jax: 0.10.0
libtpu: 0.0.40
codegen_flags: <defaults>
</compile_context>

<pallas_src>
import functools

import jax
import jax.numpy as jnp
from jax import lax
from jax.experimental import pallas as pl
from jax.experimental.pallas import tpu as pltpu


def _bn_dwconv_kernel(p_ref, x_ref, o_ref, *, N, C, H, W, eps):
    """p_ref: (N*C, 11) per-row params: col0=gamma, col1=beta, cols 2..10 = 3x3 taps (index kh*3+kw).
       x_ref / o_ref: (N*C, H*W) activations, row = n*C + c, lane = h*W + w."""
    x = x_ref[...]                                   # (NC, HW) float32
    NC, HW = x.shape
    p = p_ref[...]                                   # (NC, 11) per-row parameters

    def combine_over_batch(v):
        # v: (NC, 1) per-row totals. Sum the N rows belonging to the same channel (rows r with equal
        # r % C); result is replicated into every row of that channel. Tiny array -> cheap.
        total = v
        for i in range(1, N):
            sh = (i * C) % NC
            total = total + jnp.concatenate([v[sh:, :], v[:sh, :]], axis=0)
        return total

    # ---- BatchNorm (training mode) statistics: two-pass (numerically safe) ----
    inv_cnt = 1.0 / float(N * H * W)
    mean = combine_over_batch(jnp.sum(x, axis=1, keepdims=True)) * inv_cnt      # (NC, 1)
    xc = x - mean                                                               # centered activations
    var = combine_over_batch(jnp.sum(xc * xc, axis=1, keepdims=True)) * inv_cnt  # biased variance

    gamma = p[:, 0:1]                                # (NC, 1)
    beta = p[:, 1:2]                                 # (NC, 1)
    scale = gamma * lax.rsqrt(var + eps)
    xn = xc * scale + beta                           # normalized activations (NC, HW)

    # ---- depthwise 3x3 conv: factored taps, 4 lane rolls + 4 selects with 1-D lane masks ----
    lane = lax.broadcasted_iota(jnp.int32, (1, HW), 1)
    wpos = lane % W
    m_wm1 = wpos >= 1               # source (h, w-1) in-bounds
    m_wp1 = wpos <= W - 2           # source (h, w+1) in-bounds
    m_hm1 = lane >= W               # source (h-1, w) in-bounds
    m_hp1 = lane < (H - 1) * W      # source (h+1, w) in-bounds

    def col(t):                     # per-row tap weight, (NC, 1), index t = kh*3 + kw
        return p[:, 2 + t:3 + t]

    # w-shifted + w-masked variants (shared by all three kernel rows)
    t_m1 = jnp.where(m_wm1, pltpu.roll(xn, 1, axis=1), 0.0)        # value at (h, w-1)
    t_p1 = jnp.where(m_wp1, pltpu.roll(xn, HW - 1, axis=1), 0.0)   # value at (h, w+1)

    # kernel row kh=0 (dh = -1): weighted partial, then shift by +W lanes and mask h >= 1
    p_top = col(0) * t_m1 + col(1) * xn + col(2) * t_p1
    acc = jnp.where(m_hm1, pltpu.roll(p_top, W, axis=1), 0.0)
    # kernel row kh=2 (dh = +1): shift by -W lanes and mask h <= H-2
    p_bot = col(6) * t_m1 + col(7) * xn + col(8) * t_p1
    acc = acc + jnp.where(m_hp1, pltpu.roll(p_bot, HW - W, axis=1), 0.0)
    # kernel row kh=1 (dh = 0): no shift, no h-mask
    acc = acc + col(3) * t_m1 + col(4) * xn + col(5) * t_p1

    o_ref[...] = acc.astype(o_ref.dtype)


def bn_dwconv(x, gamma, beta, w, eps=1e-5):
    """x: (N, C, H, W) f32; gamma/beta: (C,); w: (C, 1, 3, 3) depthwise weights (groups=C)."""
    N, C, H, W = x.shape
    NC, HW = N * C, H * W

    # Pure reshape of the NCHW input -> (N*C, H*W); no transpose, no extra HBM relayout.
    x2d = x.astype(jnp.float32).reshape(NC, HW)

    # Per-row parameter block: row r (channel r % C) carries [gamma, beta, 9 taps].
    taps = w.reshape(C, 9).astype(jnp.float32)                            # (C, 9), index kh*3+kw
    params_c = jnp.concatenate(
        [gamma.astype(jnp.float32)[:, None],
         beta.astype(jnp.float32)[:, None], taps], axis=1)                # (C, 11)
    params = jnp.tile(params_c, (N, 1))                                   # (NC, 11)

    kernel = functools.partial(_bn_dwconv_kernel, N=N, C=C, H=H, W=W, eps=eps)
    out2d = pl.pallas_call(
        kernel,
        out_shape=jax.ShapeDtypeStruct((NC, HW), jnp.float32),
        grid=(1,),                                   # whole problem resident in VMEM at this size
        in_specs=[
            pl.BlockSpec((NC, 11), lambda i: (0, 0)),
            pl.BlockSpec((NC, HW), lambda i: (0, 0)),
        ],
        out_specs=pl.BlockSpec((NC, HW), lambda i: (0, 0)),
        compiler_params=pltpu.CompilerParams(dimension_semantics=("arbitrary",)),
    )(params, x2d)

    return out2d.reshape(N, C, H, W).astype(x.dtype)


if __name__ == "__main__":
    key = jax.random.PRNGKey(0)
    k1, k2, k3, k4 = jax.random.split(key, 4)

    # Small shapes consistent with the module (C must be 16 for the depthwise groups=16 conv).
    N, C, H, W = 2, 16, 16, 16
    x = jax.random.normal(k1, (N, C, H, W), jnp.float32)
    gamma = 1.0 + 0.1 * jax.random.normal(k2, (C,), jnp.float32)   # BN affine weight
    beta = 0.1 * jax.random.normal(k3, (C,), jnp.float32)          # BN affine bias
    w = 0.2 * jax.random.normal(k4, (C, 1, 3, 3), jnp.float32)     # depthwise conv weight

    out = jax.block_until_ready(bn_dwconv(x, gamma, beta, w))

    # Pure-JAX reference: training-mode BN (batch stats, biased var) + grouped 3x3 conv.
    mean = x.mean(axis=(0, 2, 3), keepdims=True)
    var = x.var(axis=(0, 2, 3), keepdims=True)
    xn = (x - mean) * lax.rsqrt(var + 1e-5) * gamma[None, :, None, None] + beta[None, :, None, None]
    ref = lax.conv_general_dilated(
        xn, w, window_strides=(1, 1), padding=((1, 1), (1, 1)),
        dimension_numbers=("NCHW", "OIHW", "NCHW"),
        feature_group_count=C, precision=lax.Precision.HIGHEST)

    err = float(jnp.max(jnp.abs(out - ref)))
    assert jnp.allclose(out, ref, atol=3e-4, rtol=3e-4), f"max abs err = {err}"
    print("KERNEL_OK")
</pallas_src>

<mosaic_0001>
module attributes {stable_mosaic.version = 11 : i64} {
  func.func @_bn_dwconv_kernel(%arg0: i32, %arg1: memref<32x11xf32, #tpu.memory_space<vmem>>, %arg2: memref<32x256xf32, #tpu.memory_space<vmem>>, %arg3: memref<32x256xf32, #tpu.memory_space<vmem>>) attributes {dimension_semantics = [#tpu.dimension_semantics<arbitrary>], iteration_bounds = array<i64: 1>, scalar_prefetch = 0 : i64, scratch_operands = 0 : i64, tpu.core_type = #tpu.core_type<tc>, window_params = [{pipeline_mode = #tpu.pipeline_mode<synchronous>, transform_indices = @transform_0, window_bounds = array<i64: 32, 11>}, {pipeline_mode = #tpu.pipeline_mode<synchronous>, transform_indices = @transform_1, window_bounds = array<i64: 32, 256>}, {pipeline_mode = #tpu.pipeline_mode<synchronous>, transform_indices = @transform_2, window_bounds = array<i64: 32, 256>}]} {
    %c0 = arith.constant 0 : index
    %c0_0 = arith.constant 0 : index
    %0 = vector.load %arg2[%c0, %c0_0] : memref<32x256xf32, #tpu.memory_space<vmem>>, vector<32x256xf32>
    %c0_1 = arith.constant 0 : index
    %c0_2 = arith.constant 0 : index
    %1 = vector.load %arg1[%c0_1, %c0_2] : memref<32x11xf32, #tpu.memory_space<vmem>>, vector<32x11xf32>
    %cst = arith.constant dense<0.000000e+00> : vector<32xf32>
    %2 = vector.multi_reduction <add>, %0, %cst [1] : vector<32x256xf32> to vector<32xf32>
    %3 = vector.shape_cast %2 : vector<32xf32> to vector<32x1xf32>
    %4 = vector.extract_strided_slice %3 {offsets = [16, 0], sizes = [16, 1], strides = [1, 1]} : vector<32x1xf32> to vector<16x1xf32>
    %5 = vector.extract_strided_slice %3 {offsets = [0, 0], sizes = [16, 1], strides = [1, 1]} : vector<32x1xf32> to vector<16x1xf32>
    %6 = tpu.concatenate %4, %5 in 0 : vector<16x1xf32>, vector<16x1xf32> -> vector<32x1xf32>
    %7 = arith.addf %3, %6 : vector<32x1xf32>
    %cst_3 = arith.constant 0.001953125 : f32
    %8 = vector.broadcast %cst_3 : f32 to vector<32x1xf32>
    %9 = arith.mulf %7, %8 : vector<32x1xf32>
    %10 = vector.broadcast %9 : vector<32x1xf32> to vector<32x256xf32>
    %11 = arith.subf %0, %10 : vector<32x256xf32>
    %12 = arith.mulf %11, %11 : vector<32x256xf32>
    %cst_4 = arith.constant dense<0.000000e+00> : vector<32xf32>
    %13 = vector.multi_reduction <add>, %12, %cst_4 [1] : vector<32x256xf32> to vector<32xf32>
    %14 = vector.shape_cast %13 : vector<32xf32> to vector<32x1xf32>
    %15 = vector.extract_strided_slice %14 {offsets = [16, 0], sizes = [16, 1], strides = [1, 1]} : vector<32x1xf32> to vector<16x1xf32>
    %16 = vector.extract_strided_slice %14 {offsets = [0, 0], sizes = [16, 1], strides = [1, 1]} : vector<32x1xf32> to vector<16x1xf32>
    %17 = tpu.concatenate %15, %16 in 0 : vector<16x1xf32>, vector<16x1xf32> -> vector<32x1xf32>
    %18 = arith.addf %14, %17 : vector<32x1xf32>
    %cst_5 = arith.constant 0.001953125 : f32
    %19 = vector.broadcast %cst_5 : f32 to vector<32x1xf32>
    %20 = arith.mulf %18, %19 : vector<32x1xf32>
    %21 = vector.extract_strided_slice %1 {offsets = [0, 0], sizes = [32, 1], strides = [1, 1]} : vector<32x11xf32> to vector<32x1xf32>
    %22 = vector.extract_strided_slice %1 {offsets = [0, 1], sizes = [32, 1], strides = [1, 1]} : vector<32x11xf32> to vector<32x1xf32>
    %cst_6 = arith.constant 9.99999974E-6 : f32
    %23 = vector.broadcast %cst_6 : f32 to vector<32x1xf32>
    %24 = arith.addf %20, %23 : vector<32x1xf32>
    %25 = math.rsqrt %24 : vector<32x1xf32>
    %26 = arith.mulf %21, %25 : vector<32x1xf32>
    %27 = vector.broadcast %26 : vector<32x1xf32> to vector<32x256xf32>
    %28 = arith.mulf %11, %27 : vector<32x256xf32>
    %29 = vector.broadcast %22 : vector<32x1xf32> to vector<32x256xf32>
    %30 = arith.addf %28, %29 : vector<32x256xf32>
    %31 = tpu.iota {dimensions = array<i32: 1>} : vector<1x256xi32>
    %c16_i32 = arith.constant 16 : i32
    %c0_i32 = arith.constant 0 : i32
    %32 = arith.cmpi eq, %c16_i32, %c0_i32 : i32
    %c1_i32 = arith.constant 1 : i32
    %33 = arith.select %32, %c1_i32, %c16_i32 : i32
    %34 = vector.broadcast %33 : i32 to vector<1x256xi32>
    %35 = arith.remsi %31, %34 : vector<1x256xi32>
    %c0_i32_7 = arith.constant 0 : i32
    %36 = vector.broadcast %c0_i32_7 : i32 to vector<1x256xi32>
    %37 = arith.cmpi ne, %35, %36 : vector<1x256xi32>
    %c0_i32_8 = arith.constant 0 : i32
    %38 = vector.broadcast %c0_i32_8 : i32 to vector<1x256xi32>
    %39 = arith.cmpi slt, %35, %38 : vector<1x256xi32>
    %c0_i32_9 = arith.constant 0 : i32
    %40 = arith.cmpi slt, %33, %c0_i32_9 : i32
    %41 = vector.broadcast %40 : i1 to vector<1x256xi1>
    %42 = vector.broadcast %41 : vector<1x256xi1> to vector<1x256xi1>
    %43 = arith.xori %39, %42 : vector<1x256xi1>
    %44 = arith.andi %43, %37 : vector<1x256xi1>
    %45 = vector.broadcast %33 : i32 to vector<1x256xi32>
    %46 = arith.addi %35, %45 : vector<1x256xi32>
    %47 = arith.select %44, %46, %35 : vector<1x256xi1>, vector<1x256xi32>
    %c1_i32_10 = arith.constant 1 : i32
    %48 = vector.broadcast %c1_i32_10 : i32 to vector<1x256xi32>
    %49 = arith.cmpi sge, %47, %48 : vector<1x256xi32>
    %c14_i32 = arith.constant 14 : i32
    %50 = vector.broadcast %c14_i32 : i32 to vector<1x256xi32>
    %51 = arith.cmpi sle, %47, %50 : vector<1x256xi32>
    %c16_i32_11 = arith.constant 16 : i32
    %52 = vector.broadcast %c16_i32_11 : i32 to vector<1x256xi32>
    %53 = arith.cmpi sge, %31, %52 : vector<1x256xi32>
    %c240_i32 = arith.constant 240 : i32
    %54 = vector.broadcast %c240_i32 : i32 to vector<1x256xi32>
    %55 = arith.cmpi slt, %31, %54 : vector<1x256xi32>
    %c1_i32_12 = arith.constant 1 : i32
    %56 = tpu.dynamic_rotate %30 by %c1_i32_12 dim 1 : vector<32x256xf32>, i32 -> vector<32x256xf32>
    %cst_13 = arith.constant 0.000000e+00 : f32
    %57 = vector.shape_cast %49 : vector<1x256xi1> to vector<1x256xi1>
    %58 = vector.broadcast %57 : vector<1x256xi1> to vector<32x256xi1>
    %59 = vector.broadcast %cst_13 : f32 to vector<32x256xf32>
    %60 = arith.select %58, %56, %59 : vector<32x256xi1>, vector<32x256xf32>
    %c255_i32 = arith.constant 255 : i32
    %61 = tpu.dynamic_rotate %30 by %c255_i32 dim 1 : vector<32x256xf32>, i32 -> vector<32x256xf32>
    %cst_14 = arith.constant 0.000000e+00 : f32
    %62 = vector.shape_cast %51 : vector<1x256xi1> to vector<1x256xi1>
    %63 = vector.broadcast %62 : vector<1x256xi1> to vector<32x256xi1>
    %64 = vector.broadcast %cst_14 : f32 to vector<32x256xf32>
    %65 = arith.select %63, %61, %64 : vector<32x256xi1>, vector<32x256xf32>
    %66 = vector.extract_strided_slice %1 {offsets = [0, 2], sizes = [32, 1], strides = [1, 1]} : vector<32x11xf32> to vector<32x1xf32>
    %67 = vector.broadcast %66 : vector<32x1xf32> to vector<32x256xf32>
    %68 = arith.mulf %67, %60 : vector<32x256xf32>
    %69 = vector.extract_strided_slice %1 {offsets = [0, 3], sizes = [32, 1], strides = [1, 1]} : vector<32x11xf32> to vector<32x1xf32>
    %70 = vector.broadcast %69 : vector<32x1xf32> to vector<32x256xf32>
    %71 = arith.mulf %70, %30 : vector<32x256xf32>
    %72 = arith.addf %68, %71 : vector<32x256xf32>
    %73 = vector.extract_strided_slice %1 {offsets = [0, 4], sizes = [32, 1], strides = [1, 1]} : vector<32x11xf32> to vector<32x1xf32>
    %74 = vector.broadcast %73 : vector<32x1xf32> to vector<32x256xf32>
    %75 = arith.mulf %74, %65 : vector<32x256xf32>
    %76 = arith.addf %72, %75 : vector<32x256xf32>
    %c16_i32_15 = arith.constant 16 : i32
    %77 = tpu.dynamic_rotate %76 by %c16_i32_15 dim 1 : vector<32x256xf32>, i32 -> vector<32x256xf32>
    %cst_16 = arith.constant 0.000000e+00 : f32
    %78 = vector.shape_cast %53 : vector<1x256xi1> to vector<1x256xi1>
    %79 = vector.broadcast %78 : vector<1x256xi1> to vector<32x256xi1>
    %80 = vector.broadcast %cst_16 : f32 to vector<32x256xf32>
    %81 = arith.select %79, %77, %80 : vector<32x256xi1>, vector<32x256xf32>
    %82 = vector.extract_strided_slice %1 {offsets = [0, 8], sizes = [32, 1], strides = [1, 1]} : vector<32x11xf32> to vector<32x1xf32>
    %83 = vector.broadcast %82 : vector<32x1xf32> to vector<32x256xf32>
    %84 = arith.mulf %83, %60 : vector<32x256xf32>
    %85 = vector.extract_strided_slice %1 {offsets = [0, 9], sizes = [32, 1], strides = [1, 1]} : vector<32x11xf32> to vector<32x1xf32>
    %86 = vector.broadcast %85 : vector<32x1xf32> to vector<32x256xf32>
    %87 = arith.mulf %86, %30 : vector<32x256xf32>
    %88 = arith.addf %84, %87 : vector<32x256xf32>
    %89 = vector.extract_strided_slice %1 {offsets = [0, 10], sizes = [32, 1], strides = [1, 1]} : vector<32x11xf32> to vector<32x1xf32>
    %90 = vector.broadcast %89 : vector<32x1xf32> to vector<32x256xf32>
    %91 = arith.mulf %90, %65 : vector<32x256xf32>
    %92 = arith.addf %88, %91 : vector<32x256xf32>
    %c240_i32_17 = arith.constant 240 : i32
    %93 = tpu.dynamic_rotate %92 by %c240_i32_17 dim 1 : vector<32x256xf32>, i32 -> vector<32x256xf32>
    %cst_18 = arith.constant 0.000000e+00 : f32
    %94 = vector.shape_cast %55 : vector<1x256xi1> to vector<1x256xi1>
    %95 = vector.broadcast %94 : vector<1x256xi1> to vector<32x256xi1>
    %96 = vector.broadcast %cst_18 : f32 to vector<32x256xf32>
    %97 = arith.select %95, %93, %96 : vector<32x256xi1>, vector<32x256xf32>
    %98 = arith.addf %81, %97 : vector<32x256xf32>
    %99 = vector.extract_strided_slice %1 {offsets = [0, 5], sizes = [32, 1], strides = [1, 1]} : vector<32x11xf32> to vector<32x1xf32>
    %100 = vector.broadcast %99 : vector<32x1xf32> to vector<32x256xf32>
    %101 = arith.mulf %100, %60 : vector<32x256xf32>
    %102 = arith.addf %98, %101 : vector<32x256xf32>
    %103 = vector.extract_strided_slice %1 {offsets = [0, 6], sizes = [32, 1], strides = [1, 1]} : vector<32x11xf32> to vector<32x1xf32>
    %104 = vector.broadcast %103 : vector<32x1xf32> to vector<32x256xf32>
    %105 = arith.mulf %104, %30 : vector<32x256xf32>
    %106 = arith.addf %102, %105 : vector<32x256xf32>
    %107 = vector.extract_strided_slice %1 {offsets = [0, 7], sizes = [32, 1], strides = [1, 1]} : vector<32x11xf32> to vector<32x1xf32>
    %108 = vector.broadcast %107 : vector<32x1xf32> to vector<32x256xf32>
    %109 = arith.mulf %108, %65 : vector<32x256xf32>
    %110 = arith.addf %106, %109 : vector<32x256xf32>
    %c0_19 = arith.constant 0 : index
    %c0_20 = arith.constant 0 : index
    %111 = vector.load %arg3[%c0_19, %c0_20] : memref<32x256xf32, #tpu.memory_space<vmem>>, vector<32x256xf32>
    tpu.vector_store %arg3[%c0_19, %c0_20], %110 {strides = array<i32>} : memref<32x256xf32, #tpu.memory_space<vmem>>, vector<32x256xf32>,
    return
  }
  func.func @transform_0(%arg0: i32) -> (i32, i32) {
    %c0_i32 = arith.constant 0 : i32
    %c0_i32_0 = arith.constant 0 : i32
    %c0_i32_1 = arith.constant 0 : i32
    return %c0_i32, %c0_i32_0 : i32, i32
  }
  func.func @transform_1(%arg0: i32) -> (i32, i32) {
    %c0_i32 = arith.constant 0 : i32
    %c0_i32_0 = arith.constant 0 : i32
    %c0_i32_1 = arith.constant 0 : i32
    return %c0_i32, %c0_i32_0 : i32, i32
  }
  func.func @transform_2(%arg0: i32) -> (i32, i32) {
    %c0_i32 = arith.constant 0 : i32
    %c0_i32_0 = arith.constant 0 : i32
    %c0_i32_1 = arith.constant 0 : i32
    return %c0_i32, %c0_i32_0 : i32, i32
  }
}

</mosaic_0001>

<bundles_post_ra>
// kernel: tpu_custom_call.1
= control target key start
LH: loop header
LB: loop body
LE: loop exit
PB: predicated region body
PF: predicated region fallthrough
CT: control target
= control target key end

     0   :  { %7 = vsyncpa [#allocation3], 0  ;;  %s1346_s0 = inlined_call_operand.vmem [shape: f32[32,11], index: 0, kind: input, shape index: {}]   ;;  %s1347_s1 = inlined_call_operand.hbm [shape: f32[32,256], index: 1, kind: input, shape index: {}]   ;;  %s1348_s2 = inlined_call_operand.hbm [shape: f32[32,256], index: 2, kind: output, shape index: {}]  }
   0x1   :  { %8 = vsyncpa [#allocation4], 0  ;;  %s743_s9 = smov [#allocation2]   ;;  %s695_s13 = scalar_lea.hbm %s1347_s1, 1024 }
   0x2   :  { %s16_s10 = sshll.u32 %s743_s9, 4  ;;  %p696_p0 = scmp.ne.s32.totalorder %s1347_s1, %s695_s13  ;;  %s17_s10 = int_to_ptr.vmem [resolvable:$true] %s16_s10 }
   0x3   :  { %p699_p1 = scmp.lt.u32.totalorder %s695_s13, %s1347_s1 }
   0x5   :  { %p701_p2 = pnand %p699_p1, %p696_p0 }
   0x7   :  { %704 = shalt.err (!%p701_p2)
}
   0x8   :  { %s705_s18 = scalar_lea.vmem %s17_s10, 1024  ;;  %p710_p4 = scmp.lt.s32.totalorder %s17_s10, %s17_s10 }
   0x9   :  { %p706_p3 = scmp.ne.s32.totalorder %s17_s10, %s705_s18  ;;  %p711_p5 = scmp.lt.s32.totalorder %s705_s18, %s705_s18 }
   0xb   :  { %p712_p6 = por %p711_p5, %p710_p4 }
   0xd   :  { %p713_p7 = pnand %p712_p6, %p706_p3 }
   0xf   :  { %716 = shalt.err (!%p713_p7)
}
  0x10   :  { %s744_s19 = smov 256   ;;  %s745_s20 = smov 16  }
  0x11   :  { %22 = dma.hbm_to_vmem [thread:$0]  %s1347_s1, 1024, %s17_s10, [#allocation3], %s744_s19, %s744_s19, %s745_s20  }
  0x12   :  { %739 = dma.done.wait [#allocation3], 1024  }
  0x13   :  { %740 = vsyncadd [#allocation3], 4294966272  ;;  %v30_v0 = vld [vmem:[#allocation2 + $0x20] sm:$0xff]  ;;  %v31_v1 = vld [vmem:[#allocation2 + $0x28] sm:$0xff]  ;;  %v746_v12 = vmov 0   ;;  %v747_v21 = vmov 1  }
  0x14   :  { %v26_v2 = vld [vmem:[#allocation2] sm:$0xff]  ;;  %v44_v3 = vadd.f32 %v31_v1, %v30_v0  ;;  %v27_v4 = vld [vmem:[#allocation2 + $0x8] sm:$0xff]  ;;  %v32_v5 = vld [vmem:[#allocation2 + $0x30] sm:$0xff]  ;;  %666 = vset.pattern.permute.xlu0 %v746_v12  ;;  %667 = vset.pattern.permute.xlu1 %v746_v12  ;;  %v748_v48 = vmov 2   ;;  %v749_v49 = vmov 3   ;;  %v750_v50 = vmov 8  }
  0x15   :  { %v33_v6 = vld [vmem:[#allocation2 + $0x38] sm:$0xff]  ;;  %v38_v7 = vadd.f32 %v27_v4, %v26_v2  ;;  %v28_v8 = vld [vmem:[#allocation2 + $0x10] sm:$0xff]  ;;  %v828_v44 = vld [vmem:[%s1346_s0] sm:$0xff]  ;;  %s756_s30 = smov 127   ;;  %s759_s3 = smov 112  }
  0x16   :  { %v29_v9 = vld [vmem:[#allocation2 + $0x18] sm:$0xff]  ;;  %45 = vadd.xlane.f32.xlu1 %v44_v3  ;;  %v47_v10 = vadd.f32 %v33_v6, %v32_v5  ;;  %v839_v46 = vld [vmem:[%s1346_s0 + $0x8] sm:$0xff]  ;;  %v846_v47 = vld [vmem:[%s1346_s0 + $0x10] sm:$0xff]  ;;  %v751_v3 = vmov 9   ;;  %s760_s4 = smov [#allocation5]  }
  0x17   :  { %39 = vadd.xlane.f32.xlu0 %v38_v7  ;;  %v41_v11 = vadd.f32 %v29_v9, %v28_v8  ;;  %v833_v45 = vld [vmem:[%s1346_s0 + $0x18] sm:$0xff]  ;;  %s755_s0 = smov 1   ;;  %s636_s5 = sshll.u32 %s760_s4, 4  ;;  %s637_s5 = int_to_ptr.vmem [resolvable:$true] %s636_s5 }
  0x18   :  { %s717_s6 = scalar_lea.vmem %s637_s5, 1024  ;;  %p722_p9 = scmp.lt.s32.totalorder %s637_s5, %s637_s5 }
  0x19   :  { %p718_p8 = scmp.ne.s32.totalorder %s637_s5, %s717_s6  ;;  %p723_p10 = scmp.lt.s32.totalorder %s717_s6, %s717_s6 }
  0x1a   :  { %48 = vadd.xlane.f32.xlu1 %v47_v10 }
  0x1b   :  { %42 = vadd.xlane.f32.xlu0 %v41_v11  ;;  %p724_p11 = por %p723_p10, %p722_p9 }
  0x1d   :  { %p725_p12 = pnand %p724_p11, %p718_p8 }
  0xa3   :  { %v46_v13 = vpop.xlane.xlu1 %45 }
  0xa4   :  { %v40_v14 = vpop.xlane.xlu0 %39 }
  0xa5   :  { %v50_v15 = vadd.f32 %v46_v13, %v40_v14 }
  0xa7   :  { %v52_v16 = vmul.f32 0.001953125, %v50_v15  ;;  %v49_v17 = vpop.xlane.xlu1 %48 }
  0xa8   :  { %v43_v18 = vpop.xlane.xlu0 %42 }
  0xa9   :  { %56 = vperm.xlu0 %666, %v52_v16   ;;  %v51_v19 = vadd.f32 %v49_v17, %v43_v18 }
  0xab   :  { %v53_v20 = vmul.f32 0.001953125, %v51_v19 }
  0xad   :  { %61 = vperm.xlu1 %667, %v53_v20   ;;  %669 = vset.pattern.permute.xlu0 %v747_v21 }
  0xb1   :  { %668 = vset.pattern.permute.xlu1 %v747_v21 }
 0x128   :  { %v57_v22 = vpop.permute.xlu0 %56 }
 0x129   :  { %v793_v23 = vsub.f32 %v26_v2, %v57_v22  ;;  %v795_v24 = vsub.f32 %v27_v4, %v57_v22  ;;  %v797_v25 = vsub.f32 %v30_v0, %v57_v22  ;;  %v799_v26 = vsub.f32 %v31_v1, %v57_v22 }
 0x12a   :  { %v752_v4 = vmov 4  }
 0x12b   :  { %v72_v27 = vmul.f32 %v793_v23, %v793_v23  ;;  %v73_v28 = vmul.f32 %v795_v24, %v795_v24  ;;  %v76_v30 = vmul.f32 %v797_v25, %v797_v25  ;;  %v77_v32 = vmul.f32 %v799_v26, %v799_v26 }
 0x12c   :  { %v62_v29 = vpop.permute.xlu1 %61 }
 0x12d   :  { %v80_v31 = vadd.f32 %v73_v28, %v72_v27  ;;  %v809_v33 = vsub.f32 %v28_v8, %v62_v29  ;;  %v811_v34 = vsub.f32 %v29_v9, %v62_v29  ;;  %v813_v35 = vsub.f32 %v32_v5, %v62_v29 }
 0x12e   :  { %v815_v36 = vsub.f32 %v33_v6, %v62_v29  ;;  %v86_v41 = vadd.f32 %v77_v32, %v76_v30  ;;  %v753_v5 = vmov 10   ;;  %v754_v6 = vmov 5  }
 0x12f   :  { %81 = vadd.xlane.f32.xlu1 %v80_v31  ;;  %v74_v37 = vmul.f32 %v809_v33, %v809_v33  ;;  %v75_v38 = vmul.f32 %v811_v34, %v811_v34  ;;  %v78_v39 = vmul.f32 %v813_v35, %v813_v35 }
 0x130   :  { %v79_v40 = vmul.f32 %v815_v36, %v815_v36 }
 0x131   :  { %v83_v42 = vadd.f32 %v75_v38, %v74_v37 }
 0x132   :  { %v89_v43 = vadd.f32 %v79_v40, %v78_v39 }
 0x133   :  { %87 = vadd.xlane.f32.xlu1 %v86_v41  ;;  %84 = vadd.xlane.f32.xlu0 %v83_v42 }
 0x137   :  { %90 = vadd.xlane.f32.xlu1 %v89_v43 }
 0x148   :  { %134 = vperm.xlu1 %668, %v828_v44  }
 0x149   :  { %149 = vperm.xlu0 %669, %v833_v45  }
 0x14c   :  { %139 = vperm.xlu1 %668, %v839_v46  }
 0x14d   :  { %670 = vset.pattern.permute.xlu0 %v748_v48 }
 0x14e   :  { %270 = vperm.xlu0 %670, %v828_v44  }
 0x150   :  { %144 = vperm.xlu1 %668, %v846_v47  }
 0x152   :  { %282 = vperm.xlu0 %670, %v833_v45  }
 0x154   :  { %671 = vset.pattern.permute.xlu1 %v748_v48 }
 0x155   :  { %274 = vperm.xlu1 %671, %v839_v46  }
 0x156   :  { %673 = vset.pattern.permute.xlu0 %v749_v49 }
 0x157   :  { %298 = vperm.xlu0 %673, %v839_v46  }
 0x159   :  { %278 = vperm.xlu1 %671, %v846_v47  }
 0x15b   :  { %676 = vset.pattern.permute.xlu0 %v746_v12 }
 0x15d   :  { %672 = vset.pattern.permute.xlu1 %v749_v49 }
 0x15e   :  { %294 = vperm.xlu1 %672, %v828_v44  }
 0x162   :  { %302 = vperm.xlu1 %672, %v846_v47  }
 0x166   :  { %306 = vperm.xlu1 %672, %v833_v45  }
 0x16a   :  { %674 = vset.pattern.permute.xlu1 %v750_v50 }
 0x16b   :  { %395 = vperm.xlu1 %674, %v828_v44  }
 0x16f   :  { %675 = vset.pattern.permute.xlu1 %v746_v12 }
 0x1bc   :  { %v82_v51 = vpop.xlane.xlu1 %81 }
 0x1c0   :  { %v88_v52 = vpop.xlane.xlu1 %87  ;;  %v85_v54 = vpop.xlane.xlu0 %84 }
 0x1c1   :  { %v92_v53 = vadd.f32 %v88_v52, %v82_v51 }
 0x1c3   :  { %v94_v55 = vmul.f32 0.001953125, %v92_v53 }
 0x1c4   :  { %v91_v56 = vpop.xlane.xlu1 %90 }
 0x1c5   :  { %v96_v57 = vadd.f32 1e-05, %v94_v55  ;;  %v93_v58 = vadd.f32 %v91_v56, %v85_v54  ;;  %v160_v56 = vlaneseq }
 0x1c7   :  { %691 = vrsqrt.f32 %v96_v57  ;;  %v95_v59 = vmul.f32 0.001953125, %v93_v58  ;;  %v977_v58 = vand.u32 127, %v160_v56 }
 0x1c8   :  { %v135_v7 = vpop.permute.xlu1 %134  ;;  %v150_v13 = vpop.permute.xlu0 %149 }
 0x1c9   :  { %v97_v60 = vadd.f32 1e-05, %v95_v59  ;;  %vm211_vm0 = vcmp.lt.s32.totalorder %v977_v58, 1  ;;  %vm248_vm3 = vcmp.lt.s32.totalorder %v977_v58, 127  ;;  %vm373_vm6 = vcmp.lt.s32.totalorder %v977_v58, 16 }
 0x1ca   :  { %vm191_vm7 = vcmp.ge.s32.totalorder %v977_v58, 16  ;;  %vm498_vm9 = vcmp.lt.s32.totalorder %v977_v58, 112 }
 0x1cb   :  { %693 = vrsqrt.f32 %v97_v60 }
 0x1cc   :  { %v140_v8 = vpop.permute.xlu1 %139 }
 0x1cd   :  { %v886_v15 = vpop.permute.xlu0 %270 }
 0x1d0   :  { %v145_v9 = vpop.permute.xlu1 %144 }
 0x1d1   :  { %v692_v61 = vpop.eup %691  ;;  %v890_v17 = vpop.permute.xlu0 %282 }
 0x1d2   :  { %v100_v62 = vmul.f32 %v692_v61, %v828_v44  ;;  %v102_v0 = vmul.f32 %v692_v61, %v846_v47  ;;  %v980_v61 = vadd.s32 128, %v977_v58 }
 0x1d4   :  { %106 = vperm.xlu1 %675, %v100_v62   ;;  %v878_v10 = vpop.permute.xlu1 %274  ;;  %1361 = vst [vmem:[#allocation11_spill] sm:$0xff] %v980_v61 }
 0x1d5   :  { %v694_v63 = vpop.eup %693 }
 0x1d6   :  { %v101_v1 = vmul.f32 %v694_v63, %v839_v46  ;;  %v103_v2 = vmul.f32 %v694_v63, %v833_v45  ;;  %v894_v19 = vpop.permute.xlu0 %298 }
 0x1d8   :  { %116 = vperm.xlu1 %675, %v102_v0   ;;  %111 = vperm.xlu0 %676, %v101_v1   ;;  %v880_v11 = vpop.permute.xlu1 %278  ;;  %v174_v0 = vand.u32 15, %v980_v61 }
 0x1da   :  { %vm988_vm1 = vcmp.ge.s32.totalorder %v174_v0, 1  ;;  %vm1070_vm5 = vcmp.le.s32.totalorder %v174_v0, 14 }
 0x1dc   :  { %121 = vperm.xlu1 %675, %v103_v2   ;;  %678 = vset.pattern.permute.xlu0 %v750_v50 }
 0x1dd   :  { %403 = vperm.xlu0 %678, %v846_v47   ;;  %v882_v12 = vpop.permute.xlu1 %294 }
 0x1e0   :  { %677 = vset.pattern.permute.xlu1 %v750_v50 }
 0x1e1   :  { %399 = vperm.xlu1 %677, %v839_v46   ;;  %680 = vset.pattern.permute.xlu0 %v751_v3  ;;  %v884_v14 = vpop.permute.xlu1 %302 }
 0x1e2   :  { %423 = vperm.xlu0 %680, %v839_v46  }
 0x1e5   :  { %407 = vperm.xlu1 %677, %v833_v45   ;;  %v888_v16 = vpop.permute.xlu1 %306 }
 0x1e6   :  { %681 = vset.pattern.permute.xlu0 %v752_v4 }
 0x1e7   :  { %326 = vperm.xlu0 %681, %v828_v44  }
 0x1e9   :  { %679 = vset.pattern.permute.xlu1 %v751_v3 }
 0x1ea   :  { %419 = vperm.xlu1 %679, %v828_v44   ;;  %v892_v18 = vpop.permute.xlu1 %395 }
 0x1eb   :  { %330 = vperm.xlu0 %681, %v839_v46  }
 0x1ee   :  { %427 = vperm.xlu1 %679, %v846_v47  }
 0x1ef   :  { %683 = vset.pattern.permute.xlu0 %v753_v5 }
 0x1f0   :  { %451 = vperm.xlu0 %683, %v828_v44  }
 0x1f2   :  { %431 = vperm.xlu1 %679, %v833_v45  }
 0x1f6   :  { %682 = vset.pattern.permute.xlu1 %v752_v4 }
 0x1f7   :  { %334 = vperm.xlu1 %682, %v846_v47  }
 0x1fb   :  { %338 = vperm.xlu1 %682, %v833_v45  }
 0x1ff   :  { %684 = vset.pattern.permute.xlu1 %v753_v5  ;;  %v167_v5 = vand.u32 15, %v977_v58 }
 0x200   :  { %455 = vperm.xlu1 %684, %v839_v46  }
 0x201   :  { %vm1003_vm2 = vcmp.ge.s32.totalorder %v167_v5, 1  ;;  %vm1032_vm4 = vcmp.le.s32.totalorder %v167_v5, 14 }
 0x204   :  { %459 = vperm.xlu1 %684, %v846_v47  }
 0x208   :  { %686 = vset.pattern.permute.xlu1 %v754_v6 }
 0x253   :  { %v107_v20 = vpop.permute.xlu1 %106 }
 0x254   :  { %v124_v21 = vmul.f32 %v107_v20, %v793_v23  ;;  %v125_v31 = vmul.f32 %v107_v20, %v795_v24 }
 0x256   :  { %v897_v22 = vadd.f32 %v135_v7, %v124_v21  ;;  %v910_v39 = vadd.f32 %v135_v7, %v125_v31 }
 0x257   :  { %v117_v27 = vpop.permute.xlu1 %116  ;;  %v112_v28 = vpop.permute.xlu0 %111 }
 0x258   :  { %v128_v29 = vmul.f32 %v117_v27, %v797_v25  ;;  %v126_v30 = vmul.f32 %v112_v28, %v809_v33  ;;  %195 = vrot.lane.b32.xlu1 %v897_v22, %s755_s0  ;;  %v129_v25 = vmul.f32 %v117_v27, %v799_v26  ;;  %v127_v33 = vmul.f32 %v112_v28, %v811_v34 }
 0x259   :  { %v757_v26 = vmov 6   ;;  %v758_v34 = vmov 7  }
 0x25a   :  { %v903_v32 = vadd.f32 %v145_v9, %v128_v29  ;;  %v905_v37 = vadd.f32 %v140_v8, %v126_v30  ;;  %v918_v24 = vadd.f32 %v145_v9, %v129_v25  ;;  %v920_v41 = vadd.f32 %v140_v8, %v127_v33 }
 0x25b   :  { %v122_v38 = vpop.permute.xlu1 %121 }
 0x25c   :  { %v130_v23 = vmul.f32 %v122_v38, %v813_v35  ;;  %199 = vrot.lane.b32.xlu0 %v903_v32, %s755_s0  ;;  %197 = vrot.lane.b32.xlu1 %v905_v37, %s755_s0  ;;  %v131_v35 = vmul.f32 %v122_v38, %v815_v36 }
 0x25e   :  { %v914_v40 = vadd.f32 %v150_v13, %v130_v23  ;;  %v925_v42 = vadd.f32 %v150_v13, %v131_v35 }
 0x260   :  { %203 = vrot.lane.b32.xlu0 %v910_v39, %s755_s0  ;;  %201 = vrot.lane.b32.xlu1 %v914_v40, %s755_s0  ;;  %v949_v36 = vpop.permute.xlu1 %399 }
 0x264   :  { %207 = vrot.lane.b32.xlu0 %v918_v24, %s755_s0  ;;  %205 = vrot.lane.b32.xlu1 %v920_v41, %s755_s0  ;;  %v951_v43 = vpop.permute.xlu1 %407 }
 0x265   :  { %1358 = vst [vmem:[#allocation8_spill] sm:$0xff] %v951_v43 }
 0x268   :  { %232 = vrot.lane.b32.xlu0 %v897_v22, %s756_s30  ;;  %209 = vrot.lane.b32.xlu1 %v925_v42, %s755_s0 }
 0x269   :  { %v953_v48 = vpop.permute.xlu1 %419 }
 0x26c   :  { %236 = vrot.lane.b32.xlu0 %v903_v32, %s756_s30  ;;  %234 = vrot.lane.b32.xlu1 %v905_v37, %s756_s30 }
 0x26d   :  { %v955_v49 = vpop.permute.xlu1 %427 }
 0x26e   :  { %v439_v27 = vmul.f32 %v955_v49, %v918_v24 }
 0x270   :  { %240 = vrot.lane.b32.xlu0 %v910_v39, %s756_s30  ;;  %238 = vrot.lane.b32.xlu1 %v914_v40, %s756_s30 }
 0x271   :  { %v957_v50 = vpop.permute.xlu1 %431 }
 0x272   :  { %1359 = vst [vmem:[#allocation9_spill] sm:$0xff] %v957_v50 }
 0x274   :  { %244 = vrot.lane.b32.xlu0 %v918_v24, %s756_s30  ;;  %242 = vrot.lane.b32.xlu1 %v920_v41, %s756_s30 }
 0x276   :  { %v961_v51 = vpop.permute.xlu1 %334 }
 0x278   :  { %463 = vperm.xlu0 %683, %v833_v45   ;;  %246 = vrot.lane.b32.xlu1 %v925_v42, %s756_s30 }
 0x27a   :  { %v965_v52 = vpop.permute.xlu1 %338 }
 0x27c   :  { %685 = vset.pattern.permute.xlu0 %v754_v6  ;;  %532 = vperm.xlu1 %686, %v839_v46  }
 0x27d   :  { %528 = vperm.xlu0 %685, %v828_v44  }
 0x280   :  { %536 = vperm.xlu1 %686, %v846_v47  }
 0x281   :  { %540 = vperm.xlu0 %685, %v833_v45  }
 0x284   :  { %687 = vset.pattern.permute.xlu1 %v757_v26 }
 0x285   :  { %688 = vset.pattern.permute.xlu0 %v757_v26  ;;  %560 = vperm.xlu1 %687, %v828_v44  }
 0x286   :  { %564 = vperm.xlu0 %688, %v839_v46  }
 0x289   :  { %568 = vperm.xlu1 %687, %v846_v47  }
 0x28a   :  { %689 = vset.pattern.permute.xlu0 %v758_v34 }
 0x28b   :  { %592 = vperm.xlu0 %689, %v828_v44   ;;  %v959_v44 = vpop.permute.xlu0 %403 }
 0x28d   :  { %572 = vperm.xlu1 %687, %v833_v45  }
 0x28f   :  { %604 = vperm.xlu0 %689, %v833_v45   ;;  %v963_v45 = vpop.permute.xlu0 %423 }
 0x290   :  { %1360 = vst [vmem:[#allocation10_spill] sm:$0xff] %v963_v45  ;;  %v437_v5 = vmul.f32 %v963_v45, %v920_v41 }
 0x291   :  { %690 = vset.pattern.permute.xlu1 %v758_v34 }
 0x292   :  { %596 = vperm.xlu1 %690, %v839_v46  }
 0x293   :  { %v967_v46 = vpop.permute.xlu0 %326 }
 0x296   :  { %600 = vperm.xlu1 %690, %v846_v47   ;;  %v969_v47 = vpop.permute.xlu1 %455 }
 0x297   :  { %v971_v53 = vpop.permute.xlu0 %330 }
 0x29a   :  { %v973_v54 = vpop.permute.xlu1 %459 }
 0x29b   :  { %v975_v55 = vpop.permute.xlu0 %451 }
 0x2ca   :  { %v196_v57 = vpop.permute.xlu1 %195 }
 0x2ce   :  { %v198_v59 = vpop.permute.xlu1 %197  ;;  %v200_v60 = vpop.permute.xlu0 %199 }
 0x2d2   :  { %v982_v62 = vpop.permute.xlu1 %201  ;;  %v204_v63 = vpop.permute.xlu0 %203 }
 0x2d3   :  { %v216_v21 = vsel %vm211_vm0, %v204_v63, %v196_v57  ;;  %v212_v31 = vsel %vm211_vm0, %v196_v57, %v204_v63 }
 0x2d4   :  { %v1023_v25 = vsel %vm1003_vm2, %v216_v21, 0.0  ;;  %v1038_v34 = vsel %vm988_vm1, %v212_v31, 0.0  ;;  %v311_v21 = vmul.f32 %v894_v19, %v905_v37 }
 0x2d5   :  { %1369 = vst [vmem:[#allocation13_spill] sm:$0xff] %v1038_v34  ;;  %v285_v63 = vmul.f32 %v886_v15, %v1023_v25 }
 0x2d6   :  { %v206_v1 = vpop.permute.xlu1 %205  ;;  %v208_v2 = vpop.permute.xlu0 %207 }
 0x2d7   :  { %v214_v3 = vsel %vm211_vm0, %v200_v60, %v208_v2  ;;  %v213_v9 = vsel %vm211_vm0, %v198_v59, %v206_v1  ;;  %v217_v28 = vsel %vm211_vm0, %v206_v1, %v198_v59  ;;  %v218_v23 = vsel %vm211_vm0, %v208_v2, %v200_v60 }
 0x2d8   :  { %v995_v6 = vsel %vm988_vm1, %v214_v3, 0.0  ;;  %v1017_v38 = vsel %vm988_vm1, %v213_v9, 0.0  ;;  %v1030_v35 = vsel %vm1003_vm2, %v217_v28, 0.0  ;;  %v1044_v57 = vsel %vm1003_vm2, %v218_v23, 0.0 }
 0x2d9   :  { %v415_v13 = vmul.f32 %v959_v44, %v995_v6  ;;  %v413_v56 = vmul.f32 %v949_v36, %v1017_v38  ;;  %v309_v3 = vmul.f32 %v882_v12, %v897_v22  ;;  %v287_v9 = vmul.f32 %v878_v10, %v1030_v35 }
 0x2da   :  { %v997_v7 = vpop.permute.xlu1 %209  ;;  %v233_v8 = vpop.permute.xlu0 %232  ;;  %v289_v28 = vmul.f32 %v880_v11, %v1044_v57  ;;  %v313_v23 = vmul.f32 %v884_v14, %v903_v32 }
 0x2db   :  { %v1026_v33 = vadd.f32 %v439_v27, %v415_v13  ;;  %v219_v1 = vsel %vm211_vm0, %v997_v7, %v982_v62  ;;  %v286_v27 = vmul.f32 %v886_v15, %v1038_v34  ;;  %v445_v61 = vadd.f32 %v437_v5, %v413_v56 }
 0x2dc   :  { %v317_v20 = vadd.f32 %v309_v3, %v285_v63  ;;  %v319_v5 = vadd.f32 %v311_v21, %v287_v9  ;;  %v321_v3 = vadd.f32 %v313_v23, %v289_v28  ;;  %v315_v28 = vmul.f32 %v888_v16, %v914_v40 }
 0x2dd   :  { %1366 = vst [vmem:[#allocation12_spill] sm:$0xff] %v1026_v33  ;;  %v215_v26 = vsel %vm211_vm0, %v982_v62, %v997_v7 }
 0x2de   :  { %v235_v29 = vpop.permute.xlu1 %234  ;;  %v237_v30 = vpop.permute.xlu0 %236  ;;  %v1155_v7 = vsel %vm988_vm1, %v215_v26, 0.0  ;;  %v435_v26 = vmul.f32 %v953_v48, %v910_v39 }
 0x2df   :  { %v292_v4 = vmul.f32 %v890_v17, %v1155_v7 }
 0x2e2   :  { %v239_v59 = vpop.permute.xlu1 %238  ;;  %v241_v60 = vpop.permute.xlu0 %240 }
 0x2e3   :  { %v249_v2 = vsel %vm248_vm3, %v233_v8, %v241_v60  ;;  %v253_v33 = vsel %vm248_vm3, %v241_v60, %v233_v8 }
 0x2e4   :  { %v1062_v13 = vsel %vm1032_vm4, %v249_v2, 0.0  ;;  %v1078_v2 = vsel %vm1003_vm2, %v219_v1, 0.0 }
 0x2e5   :  { %1372 = vst [vmem:[#allocation14_spill] sm:$0xff] %v1078_v2  ;;  %v341_v43 = vmul.f32 %v967_v46, %v1062_v13 }
 0x2e6   :  { %v243_v50 = vpop.permute.xlu1 %242  ;;  %v245_v15 = vpop.permute.xlu0 %244 }
 0x2e7   :  { %v250_v0 = vsel %vm248_vm3, %v235_v29, %v243_v50  ;;  %v254_v34 = vsel %vm248_vm3, %v243_v50, %v235_v29  ;;  %v251_v56 = vsel %vm248_vm3, %v237_v30, %v245_v15  ;;  %v291_v50 = vmul.f32 %v890_v17, %v1078_v2 }
 0x2e8   :  { %v1092_v1 = vsel %vm1032_vm4, %v250_v0, 0.0  ;;  %v1096_v8 = vsel %vm1070_vm5, %v254_v34, 0.0  ;;  %v1100_v60 = vsel %vm1032_vm4, %v251_v56, 0.0  ;;  %v1106_v29 = vsel %vm1070_vm5, %v253_v33, 0.0 }
 0x2e9   :  { %v469_v63 = vmul.f32 %v969_v47, %v1096_v8  ;;  %v255_v34 = vsel %vm248_vm3, %v245_v15, %v237_v30  ;;  %v349_v0 = vadd.f32 %v341_v43, %v317_v20  ;;  %v343_v56 = vmul.f32 %v971_v53, %v1092_v1 }
 0x2ea   :  { %v247_v45 = vpop.permute.xlu1 %246  ;;  %v345_v9 = vmul.f32 %v961_v51, %v1100_v60  ;;  %v310_v2 = vmul.f32 %v882_v12, %v910_v39  ;;  %v1133_v15 = vsel %vm1070_vm5, %v255_v34, 0.0  ;;  %v290_v20 = vmul.f32 %v880_v11, %v995_v6 }
 0x2eb   :  { %v1116_v21 = vadd.f32 %v469_v63, %v445_v61  ;;  %v252_v33 = vsel %vm248_vm3, %v239_v59, %v247_v45  ;;  %357 = vrot.lane.b32.xlu1 %v349_v0, %s745_s20  ;;  %v351_v30 = vadd.f32 %v343_v56, %v319_v5  ;;  %v342_v61 = vmul.f32 %v967_v46, %v1106_v29 }
 0x2ec   :  { %v1127_v43 = vsel %vm1032_vm4, %v252_v33, 0.0  ;;  %v353_v23 = vadd.f32 %v345_v9, %v321_v3  ;;  %v318_v5 = vadd.f32 %v310_v2, %v286_v27  ;;  %v323_v63 = vadd.f32 %v315_v28, %v291_v50 }
 0x2ed   :  { %v347_v12 = vmul.f32 %v965_v52, %v1127_v43  ;;  %359 = vrot.lane.b32.xlu0 %v351_v30, %s745_s20  ;;  %v288_v46 = vmul.f32 %v878_v10, %v1017_v38  ;;  %v314_v3 = vmul.f32 %v884_v14, %v918_v24  ;;  %v256_v34 = vsel %vm248_vm3, %v247_v45, %v239_v59 }
 0x2ee   :  { %v350_v11 = vadd.f32 %v342_v61, %v318_v5  ;;  %v346_v62 = vmul.f32 %v961_v51, %v1133_v15  ;;  %v410_v10 = vmul.f32 %v892_v18, %v1023_v25  ;;  %v312_v45 = vmul.f32 %v894_v19, %v920_v41 }
 0x2ef   :  { %361 = vrot.lane.b32.xlu1 %v353_v23, %s745_s20  ;;  %v355_v0 = vadd.f32 %v347_v12, %v323_v63  ;;  %v322_v14 = vadd.f32 %v314_v3, %v290_v20  ;;  %v344_v59 = vmul.f32 %v971_v53, %v1096_v8  ;;  %v434_v27 = vmul.f32 %v953_v48, %v897_v22  ;;  %v1373_v23 = vld [vmem:[#allocation10_spill] sm:$0xff]  ;;  %v1374_v12 = vld [vmem:[#allocation13_spill] sm:$0xff] }
 0x2f0   :  { %v1168_v51 = vsel %vm1070_vm5, %v256_v34, 0.0  ;;  %v466_v2 = vmul.f32 %v975_v55, %v1062_v13  ;;  %v320_v19 = vadd.f32 %v312_v45, %v288_v46  ;;  %v316_v53 = vmul.f32 %v888_v16, %v925_v42  ;;  %v1375_v63 = vld [vmem:[#allocation14_spill] sm:$0xff]  ;;  %v1376_v46 = vld [vmem:[#allocation8_spill] sm:$0xff] }
 0x2f1   :  { %365 = vrot.lane.b32.xlu0 %v350_v11, %s745_s20  ;;  %v354_v50 = vadd.f32 %v346_v62, %v322_v14  ;;  %v414_v56 = vmul.f32 %v959_v44, %v1044_v57  ;;  %v442_v9 = vadd.f32 %v434_v27, %v410_v10  ;;  %v348_v17 = vmul.f32 %v965_v52, %v1168_v51 }
 0x2f2   :  { %v352_v31 = vadd.f32 %v344_v59, %v320_v19  ;;  %v438_v33 = vmul.f32 %v955_v49, %v903_v32  ;;  %v412_v28 = vmul.f32 %v949_v36, %v1030_v35  ;;  %v470_v30 = vmul.f32 %v973_v54, %v1100_v60 }
 0x2f3   :  { %363 = vrot.lane.b32.xlu1 %v355_v0, %s745_s20  ;;  %v474_v16 = vadd.f32 %v466_v2, %v442_v9  ;;  %v324_v44 = vadd.f32 %v316_v53, %v292_v4  ;;  %v436_v61 = vmul.f32 %v1373_v23, %v905_v37  ;;  %v411_v20 = vmul.f32 %v892_v18, %v1374_v12  ;;  %v1378_v4 = vld [vmem:[#allocation12_spill] sm:$0xff] }
 0x2f4   :  { %v468_v52 = vmul.f32 %v969_v47, %v1092_v1  ;;  %v446_v49 = vadd.f32 %v438_v33, %v414_v56  ;;  %v416_v3 = vmul.f32 %v1376_v46, %v1375_v63  ;;  %v467_v34 = vmul.f32 %v975_v55, %v1106_v29  ;;  %v1377_v47 = vld [vmem:[#allocation9_spill] sm:$0xff] }
 0x2f5   :  { %369 = vrot.lane.b32.xlu0 %v354_v50, %s745_s20  ;;  %v356_v36 = vadd.f32 %v348_v17, %v324_v44  ;;  %v444_v11 = vadd.f32 %v436_v61, %v412_v28  ;;  %v440_v0 = vmul.f32 %v1377_v47, %v914_v40  ;;  %v443_v48 = vadd.f32 %v435_v26, %v411_v20 }
 0x2f6   :  { %v478_v18 = vadd.f32 %v470_v30, %v446_v49  ;;  %v471_v14 = vmul.f32 %v973_v54, %v1133_v15  ;;  %v417_v27 = vmul.f32 %v1376_v46, %v1155_v7  ;;  %v441_v50 = vmul.f32 %v1377_v47, %v925_v42 }
 0x2f7   :  { %367 = vrot.lane.b32.xlu1 %v352_v31, %s745_s20  ;;  %v464_v5 = vpop.permute.xlu0 %463  ;;  %v476_v10 = vadd.f32 %v468_v52, %v444_v11  ;;  %v448_v45 = vadd.f32 %v440_v0, %v416_v3  ;;  %v475_v55 = vadd.f32 %v467_v34, %v443_v48  ;;  %v1379_v11 = vld [vmem:[#allocation11_spill] sm:$0xff] }
 0x2f8   :  { %v472_v62 = vmul.f32 %v464_v5, %v1127_v43  ;;  %v479_v2 = vadd.f32 %v471_v14, %v1378_v4  ;;  %v473_v19 = vmul.f32 %v464_v5, %v1168_v51  ;;  %v449_v54 = vadd.f32 %v441_v50, %v417_v27 }
 0x2f9   :  { %482 = vrot.lane.b32.xlu0 %v474_v16, %s759_s3  ;;  %vm194_vm8 = vcmp.lt.s32.totalorder %v1379_v11, 240 }
 0x2fa   :  { %v480_v59 = vadd.f32 %v472_v62, %v448_v45  ;;  %v481_v53 = vadd.f32 %v473_v19, %v449_v54 }
 0x2fb   :  { %371 = vrot.lane.b32.xlu1 %v356_v36, %s745_s20  ;;  %v533_v56 = vpop.permute.xlu1 %532 }
 0x2fc   :  { %v529_v17 = vpop.permute.xlu0 %528  ;;  %v545_v47 = vmul.f32 %v533_v56, %v1030_v35  ;;  %v1240_v0 = vmul.f32 %v533_v56, %v1017_v38 }
 0x2fd   :  { %486 = vrot.lane.b32.xlu0 %v478_v18, %s759_s3  ;;  %v543_v62 = vmul.f32 %v529_v17, %v1023_v25 }
 0x2ff   :  { %484 = vrot.lane.b32.xlu1 %v476_v10, %s759_s3  ;;  %v537_v31 = vpop.permute.xlu1 %536  ;;  %v544_v10 = vmul.f32 %v529_v17, %v1374_v12 }
 0x300   :  { %v541_v28 = vpop.permute.xlu0 %540  ;;  %v547_v48 = vmul.f32 %v537_v31, %v1044_v57  ;;  %v548_v14 = vmul.f32 %v537_v31, %v995_v6 }
 0x301   :  { %490 = vrot.lane.b32.xlu0 %v475_v55, %s759_s3  ;;  %v1247_v45 = vmul.f32 %v541_v28, %v1375_v63  ;;  %v1252_v35 = vmul.f32 %v541_v28, %v1155_v7 }
 0x303   :  { %488 = vrot.lane.b32.xlu1 %v480_v59, %s759_s3 }
 0x304   :  { %v561_v9 = vpop.permute.xlu1 %560 }
 0x305   :  { %494 = vrot.lane.b32.xlu0 %v479_v2, %s759_s3  ;;  %v565_v16 = vpop.permute.xlu0 %564  ;;  %v575_v38 = vmul.f32 %v561_v9, %v897_v22  ;;  %v576_v25 = vmul.f32 %v561_v9, %v910_v39 }
 0x306   :  { %v577_v12 = vmul.f32 %v565_v16, %v905_v37  ;;  %v578_v57 = vmul.f32 %v565_v16, %v920_v41 }
 0x307   :  { %492 = vrot.lane.b32.xlu1 %v1116_v21, %s759_s3 }
 0x308   :  { %v569_v33 = vpop.permute.xlu1 %568 }
 0x309   :  { %v579_v6 = vmul.f32 %v569_v33, %v903_v32  ;;  %v580_v63 = vmul.f32 %v569_v33, %v918_v24 }
 0x30a   :  { %v593_v23 = vpop.permute.xlu0 %592 }
 0x30b   :  { %496 = vrot.lane.b32.xlu1 %v481_v53, %s759_s3  ;;  %v607_v27 = vmul.f32 %v593_v23, %v1062_v13  ;;  %v608_v50 = vmul.f32 %v593_v23, %v1106_v29 }
 0x30c   :  { %v1222_v30 = vpop.permute.xlu1 %572 }
 0x30e   :  { %v1228_v20 = vpop.permute.xlu0 %604 }
 0x311   :  { %v1224_v44 = vpop.permute.xlu1 %596 }
 0x312   :  { %v609_v19 = vmul.f32 %v1224_v44, %v1092_v1 }
 0x315   :  { %v1226_v61 = vpop.permute.xlu1 %600 }
 0x316   :  { %v611_v54 = vmul.f32 %v1226_v61, %v1100_v60 }
 0x35d   :  { %v358_v21 = vpop.permute.xlu1 %357 }
 0x35f   :  { %v360_v52 = vpop.permute.xlu0 %359 }
 0x361   :  { %v362_v36 = vpop.permute.xlu1 %361 }
 0x363   :  { %v366_v49 = vpop.permute.xlu0 %365 }
 0x364   :  { %v378_v55 = vsel %vm373_vm6, %v366_v49, %v358_v21  ;;  %v374_v32 = vsel %vm373_vm6, %v358_v21, %v366_v49 }
 0x365   :  { %v1230_v26 = vpop.permute.xlu1 %363  ;;  %v386_v2 = vsel %vm191_vm7, %v378_v55, 0.0 }
 0x367   :  { %v370_v5 = vpop.permute.xlu0 %369 }
 0x368   :  { %v380_v7 = vsel %vm373_vm6, %v370_v5, %v362_v36  ;;  %v376_v31 = vsel %vm373_vm6, %v362_v36, %v370_v5 }
 0x369   :  { %v368_v46 = vpop.permute.xlu1 %367  ;;  %v390_v9 = vsel %vm191_vm7, %v380_v7, 0.0 }
 0x36a   :  { %v379_v39 = vsel %vm373_vm6, %v368_v46, %v360_v52  ;;  %v375_v56 = vsel %vm373_vm6, %v360_v52, %v368_v46 }
 0x36b   :  { %v483_v3 = vpop.permute.xlu0 %482  ;;  %v388_v29 = vsel %vm191_vm7, %v379_v39, 0.0 }
 0x36d   :  { %v1232_v34 = vpop.permute.xlu1 %371 }
 0x36e   :  { %v381_v16 = vsel %vm373_vm6, %v1232_v34, %v1230_v26 }
 0x36f   :  { %v487_v18 = vpop.permute.xlu0 %486 }
 0x371   :  { %v485_v59 = vpop.permute.xlu1 %484 }
 0x373   :  { %v491_v4 = vpop.permute.xlu0 %490 }
 0x374   :  { %v499_v22 = vsel %vm498_vm9, %v483_v3, %v491_v4  ;;  %v503_v37 = vsel %vm498_vm9, %v491_v4, %v483_v3 }
 0x375   :  { %v489_v24 = vpop.permute.xlu1 %488  ;;  %v512_v41 = vsel %vm194_vm8, %v503_v37, 0.0  ;;  %v519_v13 = vadd.f32 %v499_v22, %v386_v2 }
 0x376   :  { %v520_v53 = vadd.f32 %v512_v41, %v374_v32 }
 0x377   :  { %v551_v17 = vadd.f32 %v543_v62, %v519_v13  ;;  %v495_v33 = vpop.permute.xlu0 %494 }
 0x378   :  { %v552_v28 = vadd.f32 %v544_v10, %v520_v53  ;;  %v501_v1 = vsel %vm498_vm9, %v487_v18, %v495_v33  ;;  %v505_v60 = vsel %vm498_vm9, %v495_v33, %v487_v18 }
 0x379   :  { %v583_v23 = vadd.f32 %v575_v38, %v551_v17  ;;  %v493_v21 = vpop.permute.xlu1 %492  ;;  %v516_v52 = vsel %vm194_vm8, %v505_v60, 0.0  ;;  %v523_v36 = vadd.f32 %v501_v1, %v390_v9  ;;  %v612_v38 = vmul.f32 %v1226_v61, %v1133_v15 }
 0x37a   :  { %v584_v49 = vadd.f32 %v576_v25, %v552_v28  ;;  %v500_v5 = vsel %vm498_vm9, %v485_v59, %v493_v21  ;;  %v504_v46 = vsel %vm498_vm9, %v493_v21, %v485_v59  ;;  %v524_v3 = vadd.f32 %v516_v52, %v376_v31 }
 0x37b   :  { %v615_v18 = vadd.f32 %v607_v27, %v583_v23  ;;  %v514_v62 = vsel %vm194_vm8, %v504_v46, 0.0  ;;  %v521_v10 = vadd.f32 %v500_v5, %v388_v29  ;;  %v555_v55 = vadd.f32 %v547_v48, %v523_v36 }
 0x37c   :  { %v616_v4 = vadd.f32 %v608_v50, %v584_v49  ;;  %v522_v2 = vadd.f32 %v514_v62, %v375_v56  ;;  %v556_v7 = vadd.f32 %v548_v14, %v524_v3  ;;  %v377_v25 = vsel %vm373_vm6, %v1230_v26, %v1232_v34 }
 0x37d   :  { %v392_v59 = vsel %vm191_vm7, %v381_v16, 0.0  ;;  %623 = vst [vmem:[#allocation5] sm:$0xff] %v615_v18  ;;  %v553_v27 = vadd.f32 %v545_v47, %v521_v10  ;;  %v587_v22 = vadd.f32 %v579_v6, %v555_v55  ;;  %v497_v37 = vpop.permute.xlu1 %496  ;;  %v610_v47 = vmul.f32 %v1224_v44, %v1096_v8 }
 0x37e   :  { %624 = vst [vmem:[#allocation5 + $0x8] sm:$0xff] %v616_v4  ;;  %v554_v48 = vadd.f32 %v1240_v0, %v522_v2  ;;  %v588_v32 = vadd.f32 %v580_v63, %v556_v7  ;;  %v502_v15 = vsel %vm498_vm9, %v489_v24, %v497_v37  ;;  %v506_v61 = vsel %vm498_vm9, %v497_v37, %v489_v24 }
 0x37f   :  { %v585_v14 = vadd.f32 %v577_v12, %v553_v27  ;;  %v619_v39 = vadd.f32 %v611_v54, %v587_v22  ;;  %v518_v26 = vsel %vm194_vm8, %v506_v61, 0.0  ;;  %v525_v34 = vadd.f32 %v502_v15, %v392_v59 }
 0x380   :  { %v586_v6 = vadd.f32 %v578_v57, %v554_v48  ;;  %v620_v41 = vadd.f32 %v612_v38, %v588_v32  ;;  %v526_v13 = vadd.f32 %v518_v26, %v377_v25  ;;  %v581_v0 = vmul.f32 %v1222_v30, %v914_v40 }
 0x381   :  { %v617_v63 = vadd.f32 %v609_v19, %v585_v14  ;;  %627 = vst [vmem:[#allocation5 + $0x20] sm:$0xff] %v619_v39  ;;  %v557_v58 = vadd.f32 %v1247_v45, %v525_v34  ;;  %v582_v12 = vmul.f32 %v1222_v30, %v925_v42  ;;  %v613_v8 = vmul.f32 %v1228_v20, %v1127_v43 }
 0x382   :  { %v618_v24 = vadd.f32 %v610_v47, %v586_v6  ;;  %628 = vst [vmem:[#allocation5 + $0x28] sm:$0xff] %v620_v41  ;;  %v558_v11 = vadd.f32 %v1252_v35, %v526_v13  ;;  %v614_v40 = vmul.f32 %v1228_v20, %v1168_v51 }
 0x383   :  { %625 = vst [vmem:[#allocation5 + $0x10] sm:$0xff] %v617_v63  ;;  %v589_v44 = vadd.f32 %v581_v0, %v557_v58 }
 0x384   :  { %626 = vst [vmem:[#allocation5 + $0x18] sm:$0xff] %v618_v24  ;;  %v590_v57 = vadd.f32 %v582_v12, %v558_v11 }
 0x385   :  { %v621_v45 = vadd.f32 %v613_v8, %v589_v44 }
 0x386   :  { %v622_v50 = vadd.f32 %v614_v40, %v590_v57 }
 0x387   :  { %629 = vst [vmem:[#allocation5 + $0x30] sm:$0xff] %v621_v45 }
 0x388   :  { %630 = vst [vmem:[#allocation5 + $0x38] sm:$0xff] %v622_v50 }
 0x389   :  { %728 = shalt.err (!%p725_p12)
}
 0x38a   :  { %s729_s9 = scalar_lea.hbm %s1348_s2, 1024 }
 0x38b   :  { %p730_p13 = scmp.ne.s32.totalorder %s1348_s2, %s729_s9  ;;  %p733_p0 = scmp.lt.u32.totalorder %s729_s9, %s1348_s2 }
 0x38d   :  { %p735_p1 = pnand %p733_p0, %p730_p13 }
 0x38f   :  { %738 = shalt.err (!%p735_p1)
}
 0x390   :  { %642 = dma.vmem_to_hbm [thread:$0]  %s637_s5, 1024, %s1348_s2, [#allocation4], %s744_s19, %s744_s19, %s745_s20  }
 0x391   :  { %741 = dma.done.wait [#allocation4], 1024  }
 0x392   :  { %742 = vsyncadd [#allocation4], 4294966272 }
 0x393   :  { %646 = vsyncpa [#allocation3], 1 }
 0x394   :  { %647 = vsyncpa [#allocation4], 1 }

</bundles_post_ra>
